<compile_context>
chip_gen: v6e
topology: v6e:2x2x1
jax: 0.10.0
libtpu: 0.0.40
codegen_flags: <defaults>
</compile_context>

<pallas_src>
import math

import jax
import jax.numpy as jnp
from jax.experimental import pallas as pl
from jax.experimental.pallas import tpu as pltpu


# ---------------------------------------------------------------------------
# Pallas kernel: fused mat-GRU update over one lane-dense column tile
# ---------------------------------------------------------------------------

def _gru_fused_kernel(z_ref, q_ref, wcat_ref, ucat_ref, uh_ref, bcat_ref, out_ref):
    """Fused matrix-GRU update on a (F, TK) column tile.

        [u_pre; r_pre; hW_pre] = Wcat @ z          (3F, TK)   one MXU call
        [uU_pre; rU_pre]       = Ucat @ q          (2F, TK)   one MXU call
        update = sigmoid(u_pre + uU_pre + b_u)
        reset  = sigmoid(r_pre + rU_pre + b_r)
        h_cap  = tanh(hW_pre + Uh @ (reset*q) + b_h)           one MXU call
        new_Q  = q + update * (h_cap - q)
    """
    f = q_ref.shape[0]
    z = z_ref[...]                                   # (F, TK) f32
    q = q_ref[...]                                   # (F, TK) f32
    cdt = wcat_ref.dtype                             # f32 (default) or bf16

    wz = jnp.dot(wcat_ref[...], z.astype(cdt),
                 preferred_element_type=jnp.float32)         # (3F, TK)
    uq = jnp.dot(ucat_ref[...], q.astype(cdt),
                 preferred_element_type=jnp.float32)         # (2F, TK)
    b = bcat_ref[...]                                         # (3F, TK) f32

    update = jax.nn.sigmoid(wz[:f] + uq[:f] + b[:f])
    reset = jax.nn.sigmoid(wz[f:2 * f] + uq[f:2 * f] + b[f:2 * f])
    uh_rq = jnp.dot(uh_ref[...], (reset * q).astype(cdt),
                    preferred_element_type=jnp.float32)       # (F, TK)
    h_cap = jnp.tanh(wz[2 * f:] + uh_rq + b[2 * f:])

    out_ref[...] = q + update * (h_cap - q)


# ---------------------------------------------------------------------------
# TopK scoring / selection (plain JAX: tiny matvec + top_k + gather;
# a pallas_call here is dominated by launch overhead and defeats XLA fusion)
# ---------------------------------------------------------------------------

def choose_topk(node_embs, scorer, k, mask=None):
    """TopK module: returns z_topk of shape (feats, k)."""
    scores = (node_embs @ scorer) / jnp.linalg.norm(scorer)   # (N, 1)
    if mask is None:
        mask = jnp.zeros_like(scores)
    scores = (scores + mask).reshape(-1)                      # (N,)

    vals, topk_idx = jax.lax.top_k(scores, k)

    # pad_with_last_val: if fewer than k finite-score nodes (possible with a
    # -inf mask), repeat the last valid index instead of using -inf rows.
    n_valid = jnp.sum((vals > -jnp.inf).astype(jnp.int32))
    pos = jnp.arange(k)
    safe_pos = jnp.where(pos < n_valid, pos, jnp.maximum(n_valid - 1, 0))
    idx = topk_idx[safe_pos]

    sel = node_embs[idx] * jnp.tanh(scores[idx])[:, None]     # (k, F)
    return sel.T                                              # (F, k)


# ---------------------------------------------------------------------------
# Parameter init (matches mat_GRU_gate.__init__ / reset_param)
# ---------------------------------------------------------------------------

def mat_gru_gate_params(key, rows, cols):
    """W,U ~ U(-1/sqrt(rows), +1/sqrt(rows)); bias ~ U(-1/sqrt(cols), +1/sqrt(cols))."""
    stdv_w = 1.0 / math.sqrt(rows)
    stdv_b = 1.0 / math.sqrt(cols)
    kw, ku, kb = jax.random.split(key, 3)
    W = jax.random.uniform(kw, (rows, rows), jnp.float32, -stdv_w, stdv_w)
    U = jax.random.uniform(ku, (rows, rows), jnp.float32, -stdv_w, stdv_w)
    b = jax.random.uniform(kb, (rows, cols), jnp.float32, -stdv_b, stdv_b)
    return W, U, b


def init_mat_gru_cell_params(key, input_dim, output_dim):
    k_u, k_r, k_h, k_s = jax.random.split(key, 4)
    stdv_s = 1.0 / math.sqrt(input_dim)
    return {
        "update": mat_gru_gate_params(k_u, input_dim, output_dim),
        "reset": mat_gru_gate_params(k_r, input_dim, output_dim),
        "htilda": mat_gru_gate_params(k_h, input_dim, output_dim),
        "scorer": jax.random.uniform(k_s, (input_dim, 1), jnp.float32,
                                     -stdv_s, stdv_s),
    }


# ---------------------------------------------------------------------------
# Forward wrapper
# ---------------------------------------------------------------------------

def mat_gru_cell_forward(params, prev_Q, prev_Z=None, mask=None,
                         egcn_type="EGCNH", compute_dtype=jnp.float32):
    """One matrix-GRU cell step. `compute_dtype=jnp.bfloat16` enables the native
    MXU bf16 path on v6e/v7x (elementwise math stays f32); default is f32."""
    F, K = prev_Q.shape
    if egcn_type == "EGCNO":
        z_topk = prev_Q
    elif egcn_type == "EGCNH":
        z_topk = choose_topk(prev_Z, params["scorer"], K, mask)
    else:
        raise Exception("Unsupported EvolveGCN type!")

    Wu, Uu, bu = params["update"]
    Wr, Ur, br = params["reset"]
    Wh, Uh, bh = params["htilda"]

    # Pack gate weights: 3 wide MXU calls instead of 6 tiny ones.
    Wcat = jnp.concatenate([Wu, Wr, Wh], axis=0).astype(compute_dtype)   # (3F, F)
    Ucat = jnp.concatenate([Uu, Ur], axis=0).astype(compute_dtype)       # (2F, F)
    Uh_c = Uh.astype(compute_dtype)                                      # (F, F)
    bcat = jnp.concatenate([bu, br, bh], axis=0).astype(jnp.float32)     # (3F, K)

    # Lane-dense column tiling: pad K up to a multiple of 128, slice after.
    TK = 128
    k_pad = pl.cdiv(K, TK) * TK
    pad = k_pad - K
    z_p = jnp.pad(z_topk.astype(jnp.float32), ((0, 0), (0, pad)))
    q_p = jnp.pad(prev_Q.astype(jnp.float32), ((0, 0), (0, pad)))
    b_p = jnp.pad(bcat, ((0, 0), (0, pad)))

    grid = (k_pad // TK,)

    new_q_padded = pl.pallas_call(
        _gru_fused_kernel,
        out_shape=jax.ShapeDtypeStruct((F, k_pad), jnp.float32),
        grid=grid,
        in_specs=[
            pl.BlockSpec((F, TK), lambda j: (0, j)),        # z tile
            pl.BlockSpec((F, TK), lambda j: (0, j)),        # q tile
            pl.BlockSpec((3 * F, F), lambda j: (0, 0)),     # Wcat (resident)
            pl.BlockSpec((2 * F, F), lambda j: (0, 0)),     # Ucat (resident)
            pl.BlockSpec((F, F), lambda j: (0, 0)),         # Uh   (resident)
            pl.BlockSpec((3 * F, TK), lambda j: (0, j)),    # bias tile
        ],
        out_specs=pl.BlockSpec((F, TK), lambda j: (0, j)),
        compiler_params=pltpu.CompilerParams(
            dimension_semantics=("parallel",),              # column tiles independent
            vmem_limit_bytes=48 * 1024 * 1024,              # headroom for large F
        ),
    )(z_p, q_p, Wcat, Ucat, Uh_c, b_p)

    # TODO(synk): batch multiple GRU cells (per GCN layer / timestep) into one
    # pallas_call with a leading grid axis to amortize launch overhead.
    return new_q_padded[:, :K]


# ---------------------------------------------------------------------------
# Pure-JAX reference (mirrors the PyTorch module) for sanity check
# ---------------------------------------------------------------------------

def _ref_forward(params, prev_Q, prev_Z, mask=None):
    F, K = prev_Q.shape
    scorer = params["scorer"]
    scores = prev_Z @ scorer / jnp.linalg.norm(scorer)
    if mask is None:
        mask = jnp.zeros_like(scores)
    scores = (scores + mask).reshape(-1)
    vals, idx = jax.lax.top_k(scores, K)
    z_topk = (prev_Z[idx] * jnp.tanh(scores[idx])[:, None]).T

    def gate(p, act, x, h):
        W, U, b = p
        return act(W @ x + U @ h + b)

    update = gate(params["update"], jax.nn.sigmoid, z_topk, prev_Q)
    reset = gate(params["reset"], jax.nn.sigmoid, z_topk, prev_Q)
    h_cap = gate(params["htilda"], jnp.tanh, z_topk, reset * prev_Q)
    return (1.0 - update) * prev_Q + update * h_cap


# ---------------------------------------------------------------------------
# Main
# ---------------------------------------------------------------------------

if __name__ == "__main__":
    input_dim = 32     # feats / rows
    output_dim = 16    # cols / k
    num_nodes = 64

    key = jax.random.PRNGKey(0)
    k_params, k_q, k_z = jax.random.split(key, 3)

    params = init_mat_gru_cell_params(k_params, input_dim, output_dim)
    prev_Q = jax.random.normal(k_q, (input_dim, output_dim), jnp.float32)
    prev_Z = jax.random.normal(k_z, (num_nodes, input_dim), jnp.float32)

    new_Q = mat_gru_cell_forward(params, prev_Q, prev_Z, mask=None,
                                 egcn_type="EGCNH")
    new_Q = jax.block_until_ready(new_Q)

    ref = _ref_forward(params, prev_Q, prev_Z)
    assert new_Q.shape == (input_dim, output_dim)
    assert jnp.allclose(new_Q, ref, atol=1e-5, rtol=1e-5), "mismatch vs reference"

    print("KERNEL_OK")
</pallas_src>

<mosaic_0001>
module attributes {stable_mosaic.version = 11 : i64} {
  func.func @_gru_fused_kernel(%arg0: i32, %arg1: memref<32x128xf32, #tpu.memory_space<vmem>>, %arg2: memref<32x128xf32, #tpu.memory_space<vmem>>, %arg3: memref<96x32xf32, #tpu.memory_space<vmem>>, %arg4: memref<64x32xf32, #tpu.memory_space<vmem>>, %arg5: memref<32x32xf32, #tpu.memory_space<vmem>>, %arg6: memref<96x128xf32, #tpu.memory_space<vmem>>, %arg7: memref<32x128xf32, #tpu.memory_space<vmem>>) attributes {dimension_semantics = [#tpu.dimension_semantics<parallel>], iteration_bounds = array<i64: 1>, scalar_prefetch = 0 : i64, scratch_operands = 0 : i64, tpu.core_type = #tpu.core_type<tc>, window_params = [{transform_indices = @transform_0, window_bounds = array<i64: 32, 128>}, {transform_indices = @transform_1, window_bounds = array<i64: 32, 128>}, {pipeline_mode = #tpu.pipeline_mode<synchronous>, transform_indices = @transform_2, window_bounds = array<i64: 96, 32>}, {pipeline_mode = #tpu.pipeline_mode<synchronous>, transform_indices = @transform_3, window_bounds = array<i64: 64, 32>}, {pipeline_mode = #tpu.pipeline_mode<synchronous>, transform_indices = @transform_4, window_bounds = array<i64: 32, 32>}, {transform_indices = @transform_5, window_bounds = array<i64: 96, 128>}, {transform_indices = @transform_6, window_bounds = array<i64: 32, 128>}]} {
    %c0 = arith.constant 0 : index
    %c0_0 = arith.constant 0 : index
    %0 = vector.load %arg1[%c0, %c0_0] : memref<32x128xf32, #tpu.memory_space<vmem>>, vector<32x128xf32>
    %c0_1 = arith.constant 0 : index
    %c0_2 = arith.constant 0 : index
    %1 = vector.load %arg2[%c0_1, %c0_2] : memref<32x128xf32, #tpu.memory_space<vmem>>, vector<32x128xf32>
    %c0_3 = arith.constant 0 : index
    %c0_4 = arith.constant 0 : index
    %2 = vector.load %arg3[%c0_3, %c0_4] : memref<96x32xf32, #tpu.memory_space<vmem>>, vector<96x32xf32>
    %cst = arith.constant dense<0.000000e+00> : vector<96x128xf32>
    %3 = tpu.matmul %2, %0, %cst {dimension_numbers = #tpu.dot_dimension_numbers<[1], [0], [0], [1], [0, 0, 1, 1], [], []>} : vector<96x32xf32>, vector<32x128xf32>, vector<96x128xf32> -> vector<96x128xf32>
    %c0_5 = arith.constant 0 : index
    %c0_6 = arith.constant 0 : index
    %4 = vector.load %arg4[%c0_5, %c0_6] : memref<64x32xf32, #tpu.memory_space<vmem>>, vector<64x32xf32>
    %cst_7 = arith.constant dense<0.000000e+00> : vector<64x128xf32>
    %5 = tpu.matmul %4, %1, %cst_7 {dimension_numbers = #tpu.dot_dimension_numbers<[1], [0], [0], [1], [0, 0, 1, 1], [], []>} : vector<64x32xf32>, vector<32x128xf32>, vector<64x128xf32> -> vector<64x128xf32>
    %c0_8 = arith.constant 0 : index
    %c0_9 = arith.constant 0 : index
    %6 = vector.load %arg6[%c0_8, %c0_9] : memref<96x128xf32, #tpu.memory_space<vmem>>, vector<96x128xf32>
    %7 = vector.extract_strided_slice %3 {offsets = [0, 0], sizes = [32, 128], strides = [1, 1]} : vector<96x128xf32> to vector<32x128xf32>
    %8 = vector.extract_strided_slice %5 {offsets = [0, 0], sizes = [32, 128], strides = [1, 1]} : vector<64x128xf32> to vector<32x128xf32>
    %9 = arith.addf %7, %8 : vector<32x128xf32>
    %10 = vector.extract_strided_slice %6 {offsets = [0, 0], sizes = [32, 128], strides = [1, 1]} : vector<96x128xf32> to vector<32x128xf32>
    %11 = arith.addf %9, %10 : vector<32x128xf32>
    %12 = arith.negf %11 : vector<32x128xf32>
    %13 = math.exp %12 : vector<32x128xf32>
    %cst_10 = arith.constant 1.000000e+00 : f32
    %14 = vector.broadcast %cst_10 : f32 to vector<32x128xf32>
    %15 = arith.addf %14, %13 : vector<32x128xf32>
    %16 = arith.divf %14, %15 : vector<32x128xf32>
    %17 = vector.extract_strided_slice %3 {offsets = [32, 0], sizes = [32, 128], strides = [1, 1]} : vector<96x128xf32> to vector<32x128xf32>
    %18 = vector.extract_strided_slice %5 {offsets = [32, 0], sizes = [32, 128], strides = [1, 1]} : vector<64x128xf32> to vector<32x128xf32>
    %19 = arith.addf %17, %18 : vector<32x128xf32>
    %20 = vector.extract_strided_slice %6 {offsets = [32, 0], sizes = [32, 128], strides = [1, 1]} : vector<96x128xf32> to vector<32x128xf32>
    %21 = arith.addf %19, %20 : vector<32x128xf32>
    %22 = arith.negf %21 : vector<32x128xf32>
    %23 = math.exp %22 : vector<32x128xf32>
    %cst_11 = arith.constant 1.000000e+00 : f32
    %24 = vector.broadcast %cst_11 : f32 to vector<32x128xf32>
    %25 = arith.addf %24, %23 : vector<32x128xf32>
    %26 = arith.divf %24, %25 : vector<32x128xf32>
    %c0_12 = arith.constant 0 : index
    %c0_13 = arith.constant 0 : index
    %27 = vector.load %arg5[%c0_12, %c0_13] : memref<32x32xf32, #tpu.memory_space<vmem>>, vector<32x32xf32>
    %28 = arith.mulf %26, %1 : vector<32x128xf32>
    %cst_14 = arith.constant dense<0.000000e+00> : vector<32x128xf32>
    %29 = tpu.matmul %27, %28, %cst_14 {dimension_numbers = #tpu.dot_dimension_numbers<[1], [0], [0], [1], [0, 0, 1, 1], [], []>} : vector<32x32xf32>, vector<32x128xf32>, vector<32x128xf32> -> vector<32x128xf32>
    %30 = vector.extract_strided_slice %3 {offsets = [64, 0], sizes = [32, 128], strides = [1, 1]} : vector<96x128xf32> to vector<32x128xf32>
    %31 = arith.addf %30, %29 : vector<32x128xf32>
    %32 = vector.extract_strided_slice %6 {offsets = [64, 0], sizes = [32, 128], strides = [1, 1]} : vector<96x128xf32> to vector<32x128xf32>
    %33 = arith.addf %31, %32 : vector<32x128xf32>
    %34 = math.tanh %33 : vector<32x128xf32>
    %35 = arith.subf %34, %1 : vector<32x128xf32>
    %36 = arith.mulf %16, %35 : vector<32x128xf32>
    %37 = arith.addf %1, %36 : vector<32x128xf32>
    %c0_15 = arith.constant 0 : index
    %c0_16 = arith.constant 0 : index
    %38 = vector.load %arg7[%c0_15, %c0_16] : memref<32x128xf32, #tpu.memory_space<vmem>>, vector<32x128xf32>
    tpu.vector_store %arg7[%c0_15, %c0_16], %37 {strides = array<i32>} : memref<32x128xf32, #tpu.memory_space<vmem>>, vector<32x128xf32>,
    return
  }
  func.func @transform_0(%arg0: i32) -> (i32, i32) {
    %c0_i32 = arith.constant 0 : i32
    %c0_i32_0 = arith.constant 0 : i32
    return %c0_i32, %arg0 : i32, i32
  }
  func.func @transform_1(%arg0: i32) -> (i32, i32) {
    %c0_i32 = arith.constant 0 : i32
    %c0_i32_0 = arith.constant 0 : i32
    return %c0_i32, %arg0 : i32, i32
  }
  func.func @transform_2(%arg0: i32) -> (i32, i32) {
    %c0_i32 = arith.constant 0 : i32
    %c0_i32_0 = arith.constant 0 : i32
    %c0_i32_1 = arith.constant 0 : i32
    return %c0_i32, %c0_i32_0 : i32, i32
  }
  func.func @transform_3(%arg0: i32) -> (i32, i32) {
    %c0_i32 = arith.constant 0 : i32
    %c0_i32_0 = arith.constant 0 : i32
    %c0_i32_1 = arith.constant 0 : i32
    return %c0_i32, %c0_i32_0 : i32, i32
  }
  func.func @transform_4(%arg0: i32) -> (i32, i32) {
    %c0_i32 = arith.constant 0 : i32
    %c0_i32_0 = arith.constant 0 : i32
    %c0_i32_1 = arith.constant 0 : i32
    return %c0_i32, %c0_i32_0 : i32, i32
  }
  func.func @transform_5(%arg0: i32) -> (i32, i32) {
    %c0_i32 = arith.constant 0 : i32
    %c0_i32_0 = arith.constant 0 : i32
    return %c0_i32, %arg0 : i32, i32
  }
  func.func @transform_6(%arg0: i32) -> (i32, i32) {
    %c0_i32 = arith.constant 0 : i32
    %c0_i32_0 = arith.constant 0 : i32
    return %c0_i32, %arg0 : i32, i32
  }
}

</mosaic_0001>

<bundles_post_ra>
// kernel: tpu_custom_call.1
= control target key start
LH: loop header
LB: loop body
LE: loop exit
PB: predicated region body
PF: predicated region fallthrough
CT: control target
= control target key end

     0   :  { %vm44_vm0 = vcmask 261120   ;;  %s998_s0 = inlined_call_operand.vmem [shape: f32[32,128], index: 0, kind: input, shape index: {}]   ;;  %s999_s1 = inlined_call_operand.vmem [shape: f32[32,128], index: 1, kind: input, shape index: {}]   ;;  %s1000_s2 = inlined_call_operand.vmem [shape: f32[96,32], index: 2, kind: input, shape index: {}]   ;;  %s1001_s3 = inlined_call_operand.vmem [shape: f32[64,32], index: 3, kind: input, shape index: {}]   ;;  %s1002_s4 = inlined_call_operand.vmem [shape: f32[32,32], index: 4, kind: input, shape index: {}]   ;;  %s1003_s5 = inlined_call_operand.vmem [shape: f32[96,128], index: 5, kind: input, shape index: {}]   ;;  %s1004_s6 = inlined_call_operand.hbm [shape: f32[32,128], index: 6, kind: output, shape index: {}]  }
   0x1   :  { %v27_v0 = vld [vmem:[%s998_s0 + $0x18] sm:$0xff]  ;;  %v26_v2 = vld [vmem:[%s998_s0 + $0x10] sm:$0xff]  ;;  %v25_v4 = vld [vmem:[%s998_s0 + $0x8] sm:$0xff] }
   0x2   :  { %v805_v1 = vld [vmem:[%s999_s1 + $0x18] sm:$0xff]  ;;  %636 = vmatprep.subr.mxu0 %v27_v0  ;;  %v814_v3 = vld [vmem:[%s999_s1 + $0x10] sm:$0xff]  ;;  %v823_v5 = vld [vmem:[%s999_s1 + $0x8] sm:$0xff] }
   0x3   :  { %662 = vmatprep.subr.mxu1 %v805_v1  ;;  %637 = vmatpush3.msra.mxu0 %v27_v0  ;;  %v24_v6 = vld [vmem:[%s998_s0] sm:$0xff]  ;;  %v33_v10 = vld [vmem:[%s1000_s2 + $0x8] sm:$0xff]  ;;  %v34_v12 = vld [vmem:[%s1000_s2 + $0x10] sm:$0xff] }
   0x4   :  { %663 = vmatpush3.msra.mxu1 %v805_v1  ;;  %638 = vmatprep.subr.mxu0 %v26_v2  ;;  %v833_v7 = vld [vmem:[%s999_s1] sm:$0xff]  ;;  %v207_v11 = vld [vmem:[%s1001_s3 + $0x8] sm:$0xff]  ;;  %v208_v13 = vld [vmem:[%s1001_s3 + $0x10] sm:$0xff] }
   0x5   :  { %664 = vmatprep.subr.mxu1 %v814_v3  ;;  %639 = vmatpush3.msra.mxu0 %v26_v2  ;;  %v32_v8 = vld [vmem:[%s1000_s2] sm:$0xff] }
   0x6   :  { %665 = vmatpush3.msra.mxu1 %v814_v3  ;;  %640 = vmatprep.subr.mxu0 %v25_v4  ;;  %v206_v9 = vld [vmem:[%s1001_s3] sm:$0xff] }
   0x7   :  { %666 = vmatprep.subr.mxu1 %v823_v5  ;;  %641 = vmatpush3.msra.mxu0 %v25_v4 }
   0x8   :  { %667 = vmatpush3.msra.mxu1 %v823_v5  ;;  %642 = vmatprep.subr.mxu0 %v24_v6 }
   0x9   :  { %668 = vmatprep.subr.mxu1 %v833_v7  ;;  %643 = vmatpush3.msra.mxu0 %v24_v6 }
   0xa   :  { %644 = vmatprep.mubr.msk.f32.mxu0 %vm44_vm0, %v32_v8 }
   0xb   :  { %11 = vsyncpa [#allocation3], 0  ;;  %669 = vmatpush3.msra.mxu1 %v833_v7  ;;  %670 = vmatprep.mubr.msk.f32.mxu1 %vm44_vm0, %v206_v9  ;;  %v35_v14 = vld [vmem:[%s1000_s2 + $0x18] sm:$0xff]  ;;  %v36_v16 = vld [vmem:[%s1000_s2 + $0x20] sm:$0xff] }
   0xc   :  { %645 = vmatmul.mubr.msk.f32.vlgmr.msra.gmra.mxu0 %vm44_vm0, %v33_v10  ;;  %671 = vmatmul.mubr.msk.f32.vlgmr.msra.gmra.mxu1 %vm44_vm0, %v207_v11  ;;  %v209_v15 = vld [vmem:[%s1001_s3 + $0x18] sm:$0xff]  ;;  %v210_v17 = vld [vmem:[%s1001_s3 + $0x20] sm:$0xff]  ;;  %v37_v18 = vld [vmem:[%s1000_s2 + $0x28] sm:$0xff] }
   0xd   :  { %647 = vmatprep.mubr.msk.f32.mxu0 %vm44_vm0, %v34_v12  ;;  %673 = vmatprep.mubr.msk.f32.mxu1 %vm44_vm0, %v208_v13  ;;  %v211_v19 = vld [vmem:[%s1001_s3 + $0x28] sm:$0xff]  ;;  %v38_v20 = vld [vmem:[%s1000_s2 + $0x30] sm:$0xff]  ;;  %v39_v22 = vld [vmem:[%s1000_s2 + $0x38] sm:$0xff] }
   0xe   :  { %v212_v21 = vld [vmem:[%s1001_s3 + $0x30] sm:$0xff]  ;;  %v213_v23 = vld [vmem:[%s1001_s3 + $0x38] sm:$0xff]  ;;  %v40_v24 = vld [vmem:[%s1000_s2 + $0x40] sm:$0xff] }
   0xf   :  { %v41_v25 = vld [vmem:[%s1000_s2 + $0x48] sm:$0xff]  ;;  %v419_v26 = vld [vmem:[%s1002_s4] sm:$0xff]  ;;  %v42_v27 = vld [vmem:[%s1000_s2 + $0x50] sm:$0xff] }
  0x10   :  { %648 = vmatmul.mubr.msk.f32.gmra.mxu0 %vm44_vm0, %v35_v14  ;;  %674 = vmatmul.mubr.msk.f32.gmra.mxu1 %vm44_vm0, %v209_v15  ;;  %v43_v28 = vld [vmem:[%s1000_s2 + $0x58] sm:$0xff]  ;;  %v348_v43 = vld [vmem:[%s1003_s5 + $0x28] sm:$0xff]  ;;  %v347_v47 = vld [vmem:[%s1003_s5 + $0x20] sm:$0xff] }
  0x11   :  { %650 = vmatprep.mubr.msk.f32.mxu0 %vm44_vm0, %v36_v16  ;;  %676 = vmatprep.mubr.msk.f32.mxu1 %vm44_vm0, %v210_v17  ;;  %v350_v52 = vld [vmem:[%s1003_s5 + $0x38] sm:$0xff]  ;;  %v349_v58 = vld [vmem:[%s1003_s5 + $0x30] sm:$0xff] }
  0x14   :  { %651 = vmatmul.mubr.msk.f32.gmra.mxu0 %vm44_vm0, %v37_v18  ;;  %677 = vmatmul.mubr.msk.f32.gmra.mxu1 %vm44_vm0, %v211_v19 }
  0x15   :  { %653 = vmatprep.mubr.msk.f32.mxu0 %vm44_vm0, %v38_v20  ;;  %679 = vmatprep.mubr.msk.f32.mxu1 %vm44_vm0, %v212_v21  ;;  %v420_v21 = vld [vmem:[%s1002_s4 + $0x8] sm:$0xff] }
  0x18   :  { %654 = vmatmul.mubr.msk.f32.gmra.mxu0 %vm44_vm0, %v39_v22  ;;  %680 = vmatmul.mubr.msk.f32.gmra.mxu1 %vm44_vm0, %v213_v23  ;;  %v421_v22 = vld [vmem:[%s1002_s4 + $0x10] sm:$0xff]  ;;  %v422_v23 = vld [vmem:[%s1002_s4 + $0x18] sm:$0xff] }
  0x19   :  { %656 = vmatprep.mubr.msk.f32.mxu0 %vm44_vm0, %v40_v24  ;;  %690 = vmatprep.mubr.msk.f32.mxu1 %vm44_vm0, %v419_v26  ;;  %v344_v24 = vld [vmem:[%s1003_s5 + $0x8] sm:$0xff] }
  0x1c   :  { %657 = vmatmul.mubr.msk.f32.gmra.mxu0 %vm44_vm0, %v41_v25  ;;  %v343_v25 = vld [vmem:[%s1003_s5] sm:$0xff] }
  0x1d   :  { %659 = vmatprep.mubr.msk.f32.mxu0 %vm44_vm0, %v42_v27  ;;  %v346_v27 = vld [vmem:[%s1003_s5 + $0x18] sm:$0xff] }
  0x20   :  { %660 = vmatmul.mubr.msk.f32.gmra.mxu0 %vm44_vm0, %v43_v28 }
  0xcc   :  { %v646_v29 = vpop.f32.mrf.mxu0  ;;  %v672_v30 = vpop.f32.mrf.mxu1 }
  0xcd   :  { %v923_v31 = vadd.f32 %v672_v30, %v646_v29 }
  0xce   :  { %v147_v32 = vpop.f32.mrf.mxu0  ;;  %v304_v33 = vpop.f32.mrf.mxu1 }
  0xcf   :  { %v925_v34 = vadd.f32 %v304_v33, %v147_v32  ;;  %v360_v26 = vadd.f32 %v923_v31, %v344_v24  ;;  %v345_v32 = vld [vmem:[%s1003_s5 + $0x10] sm:$0xff] }
  0xd0   :  { %v649_v35 = vpop.f32.mrf.mxu0  ;;  %v675_v36 = vpop.f32.mrf.mxu1 }
  0xd1   :  { %v927_v37 = vadd.f32 %v675_v36, %v649_v35  ;;  %v359_v28 = vadd.f32 %v925_v34, %v343_v25  ;;  %v589_v29 = vmul.f32 -1.442695, %v360_v26  ;;  %v352_v34 = vld [vmem:[%s1003_s5 + $0x48] sm:$0xff] }
  0xd2   :  { %v157_v38 = vpop.f32.mrf.mxu0  ;;  %v314_v39 = vpop.f32.mrf.mxu1 }
  0xd3   :  { %v929_v40 = vadd.f32 %v314_v39, %v157_v38  ;;  %v362_v30 = vadd.f32 %v927_v37, %v346_v27  ;;  %v588_v33 = vmul.f32 -1.442695, %v359_v28 }
  0xd4   :  { %v652_v41 = vpop.f32.mrf.mxu0  ;;  %v678_v42 = vpop.f32.mrf.mxu1 }
  0xd5   :  { %v388_v44 = vadd.f32 %v678_v42, %v652_v41  ;;  %v361_v35 = vadd.f32 %v929_v40, %v345_v32  ;;  %v591_v36 = vmul.f32 -1.442695, %v362_v30  ;;  %v351_v40 = vld [vmem:[%s1003_s5 + $0x40] sm:$0xff] }
  0xd6   :  { %v167_v45 = vpop.f32.mrf.mxu0  ;;  %v324_v46 = vpop.f32.mrf.mxu1 }
  0xd7   :  { %v392_v48 = vadd.f32 %v388_v44, %v348_v43  ;;  %v387_v49 = vadd.f32 %v324_v46, %v167_v45  ;;  %v590_v31 = vmul.f32 -1.442695, %v361_v35 }
  0xd8   :  { %v655_v50 = vpop.f32.mrf.mxu0  ;;  %v681_v51 = vpop.f32.mrf.mxu1 }
  0xd9   :  { %v593_v53 = vmul.f32 -1.442695, %v392_v48  ;;  %v391_v54 = vadd.f32 %v387_v49, %v347_v47  ;;  %v390_v55 = vadd.f32 %v681_v51, %v655_v50  ;;  %v354_v51 = vld [vmem:[%s1003_s5 + $0x58] sm:$0xff] }
  0xda   :  { %v177_v56 = vpop.f32.mrf.mxu0  ;;  %v334_v57 = vpop.f32.mrf.mxu1 }
  0xdb   :  { %v592_v59 = vmul.f32 -1.442695, %v391_v54  ;;  %v394_v60 = vadd.f32 %v390_v55, %v350_v52  ;;  %v389_v61 = vadd.f32 %v334_v57, %v177_v56  ;;  %699 = vpow2.f32 %v593_v53 }
  0xdc   :  { %v658_v38 = vpop.f32.mrf.mxu0 }
  0xdd   :  { %v595_v62 = vmul.f32 -1.442695, %v394_v60  ;;  %v393_v63 = vadd.f32 %v389_v61, %v349_v58  ;;  %701 = vpow2.f32 %v592_v59  ;;  %v353_v58 = vld [vmem:[%s1003_s5 + $0x50] sm:$0xff]  ;;  %s761_s5 = smov [#allocation2]  }
  0xde   :  { %v187_v39 = vpop.f32.mrf.mxu0  ;;  %s557_s26 = sshll.u32 %s761_s5, 4  ;;  %s558_s26 = int_to_ptr.vmem [resolvable:$true] %s557_s26 }
  0xdf   :  { %703 = vpow2.f32 %v595_v62  ;;  %v594_v0 = vmul.f32 -1.442695, %v393_v63  ;;  %s739_s27 = scalar_lea.vmem %s558_s26, 512  ;;  %p744_p1 = scmp.lt.s32.totalorder %s558_s26, %s558_s26 }
  0xe0   :  { %v661_v46 = vpop.f32.mrf.mxu0  ;;  %p740_p0 = scmp.ne.s32.totalorder %s558_s26, %s739_s27  ;;  %p745_p2 = scmp.lt.s32.totalorder %s739_s27, %s739_s27 }
  0xe1   :  { %705 = vpow2.f32 %v594_v0 }
  0xe2   :  { %v197_v57 = vpop.f32.mrf.mxu0  ;;  %p746_p3 = por %p745_p2, %p744_p1 }
  0xe4   :  { %p747_p4 = pnand %p746_p3, %p740_p0 }
  0xe8   :  { %v700_v2 = vpop.eup %699 }
  0xe9   :  { %v408_v8 = vadd.f32 1.0, %v700_v2 }
  0xea   :  { %v702_v4 = vpop.eup %701 }
  0xeb   :  { %v407_v11 = vadd.f32 1.0, %v702_v4 }
  0xec   :  { %v704_v6 = vpop.eup %703 }
  0xed   :  { %v410_v9 = vadd.f32 1.0, %v704_v6 }
  0xee   :  { %v706_v10 = vpop.eup %705 }
  0xef   :  { %707 = vrcp.f32 %v410_v9  ;;  %v409_v12 = vadd.f32 1.0, %v706_v10 }
  0xf0   :  { %709 = vrcp.f32 %v408_v8 }
  0xf1   :  { %711 = vrcp.f32 %v409_v12 }
  0xf2   :  { %713 = vrcp.f32 %v407_v11 }
  0xf3   :  { %715 = vpow2.f32 %v589_v29 }
  0xf4   :  { %717 = vpow2.f32 %v588_v33 }
  0xf5   :  { %719 = vpow2.f32 %v591_v36 }
  0xf6   :  { %721 = vpow2.f32 %v590_v31 }
  0xfc   :  { %v708_v13 = vpop.eup %707 }
  0xfd   :  { %v710_v14 = vpop.eup %709  ;;  %v426_v15 = vmul.f32 %v708_v13, %v805_v1 }
  0xfe   :  { %v712_v16 = vpop.eup %711  ;;  %v424_v19 = vmul.f32 %v710_v14, %v823_v5 }
  0xff   :  { %682 = vmatprep.subr.mxu1 %v426_v15  ;;  %v425_v17 = vmul.f32 %v712_v16, %v814_v3  ;;  %v714_v18 = vpop.eup %713 }
 0x100   :  { %683 = vmatpush3.msra.mxu1 %v426_v15  ;;  %v423_v20 = vmul.f32 %v714_v18, %v833_v7  ;;  %v716_v41 = vpop.eup %715 }
 0x101   :  { %684 = vmatprep.subr.mxu1 %v425_v17  ;;  %v718_v42 = vpop.eup %717  ;;  %v376_v44 = vadd.f32 1.0, %v716_v41 }
 0x102   :  { %685 = vmatpush3.msra.mxu1 %v425_v17  ;;  %v720_v47 = vpop.eup %719  ;;  %v375_v50 = vadd.f32 1.0, %v718_v42 }
 0x103   :  { %686 = vmatprep.subr.mxu1 %v424_v19  ;;  %v722_v55 = vpop.eup %721  ;;  %v378_v56 = vadd.f32 1.0, %v720_v47 }
 0x104   :  { %687 = vmatpush3.msra.mxu1 %v424_v19  ;;  %v377_v62 = vadd.f32 1.0, %v722_v55 }
 0x105   :  { %688 = vmatprep.subr.mxu1 %v423_v20 }
 0x106   :  { %689 = vmatpush3.msra.mxu1 %v423_v20 }
 0x107   :  { %691 = vmatmul.mubr.msk.f32.vlgmr.msra.gmra.mxu1 %vm44_vm0, %v420_v21 }
 0x108   :  { %693 = vmatprep.mubr.msk.f32.mxu1 %vm44_vm0, %v421_v22 }
 0x10b   :  { %694 = vmatmul.mubr.msk.f32.gmra.mxu1 %vm44_vm0, %v422_v23 }
 0x1c7   :  { %v692_v37 = vpop.f32.mrf.mxu1 }
 0x1c8   :  { %v525_v43 = vadd.f32 %v692_v37, %v658_v38 }
 0x1c9   :  { %v505_v45 = vpop.f32.mrf.mxu1 }
 0x1ca   :  { %v529_v48 = vadd.f32 %v525_v43, %v352_v34  ;;  %v524_v49 = vadd.f32 %v505_v45, %v187_v39 }
 0x1cb   :  { %v695_v52 = vpop.f32.mrf.mxu1 }
 0x1cc   :  { %723 = vtanh.f32 %v529_v48  ;;  %v528_v53 = vadd.f32 %v524_v49, %v351_v40  ;;  %v527_v54 = vadd.f32 %v695_v52, %v661_v46 }
 0x1cd   :  { %725 = vrcp.f32 %v376_v44  ;;  %v515_v59 = vpop.f32.mrf.mxu1 }
 0x1ce   :  { %727 = vtanh.f32 %v528_v53  ;;  %v531_v60 = vadd.f32 %v527_v54, %v354_v51  ;;  %v526_v61 = vadd.f32 %v515_v59, %v197_v57 }
 0x1cf   :  { %729 = vrcp.f32 %v375_v50 }
 0x1d0   :  { %731 = vtanh.f32 %v531_v60  ;;  %v530_v63 = vadd.f32 %v526_v61, %v353_v58 }
 0x1d1   :  { %733 = vrcp.f32 %v378_v56 }
 0x1d2   :  { %735 = vtanh.f32 %v530_v63 }
 0x1d3   :  { %737 = vrcp.f32 %v377_v62 }
 0x1d9   :  { %v724_v0 = vpop.eup %723 }
 0x1da   :  { %v726_v2 = vpop.eup %725  ;;  %v537_v4 = vsub.f32 %v724_v0, %v823_v5 }
 0x1db   :  { %v728_v6 = vpop.eup %727 }
 0x1dc   :  { %v730_v8 = vpop.eup %729  ;;  %v536_v9 = vsub.f32 %v728_v6, %v833_v7  ;;  %v541_v10 = vmul.f32 %v726_v2, %v537_v4 }
 0x1dd   :  { %v732_v11 = vpop.eup %731 }
 0x1de   :  { %v734_v12 = vpop.eup %733  ;;  %v539_v13 = vsub.f32 %v732_v11, %v805_v1  ;;  %v540_v14 = vmul.f32 %v730_v8, %v536_v9  ;;  %v545_v15 = vadd.f32 %v541_v10, %v823_v5 }
 0x1df   :  { %v736_v16 = vpop.eup %735 }
 0x1e0   :  { %v538_v17 = vsub.f32 %v736_v16, %v814_v3  ;;  %v543_v18 = vmul.f32 %v734_v12, %v539_v13  ;;  %v544_v19 = vadd.f32 %v540_v14, %v833_v7  ;;  %549 = vst [vmem:[#allocation2 + $0x8] sm:$0xff] %v545_v15  ;;  %v738_v20 = vpop.eup %737 }
 0x1e2   :  { %v542_v21 = vmul.f32 %v738_v20, %v538_v17  ;;  %v547_v22 = vadd.f32 %v543_v18, %v805_v1  ;;  %548 = vst [vmem:[#allocation2] sm:$0xff] %v544_v19 }
 0x1e4   :  { %v546_v23 = vadd.f32 %v542_v21, %v814_v3  ;;  %551 = vst [vmem:[#allocation2 + $0x18] sm:$0xff] %v547_v22 }
 0x1e6   :  { %550 = vst [vmem:[#allocation2 + $0x10] sm:$0xff] %v546_v23 }
 0x1e7   :  { %750 = shalt.err (!%p747_p4)
}
 0x1e8   :  { %s762_s28 = smov 128   ;;  %s763_s29 = smov 8  }
 0x1e9   :  { %563 = dma.vmem_to_hbm [thread:$0]  %s558_s26, 512, %s1004_s6, [#allocation3], %s762_s28, %s762_s28, %s763_s29  }
 0x1ea   :  { %759 = dma.done.wait [#allocation3], 512  }
 0x1eb   :  { %760 = vsyncadd [#allocation3], 4294966784 }
 0x1ec   :  { %567 = vsyncpa [#allocation3], 1 }

</bundles_post_ra>
